<compile_context>
chip_gen: v6e
topology: v6e:2x2x1
jax: 0.10.0
libtpu: 0.0.40
codegen_flags: <defaults>
</compile_context>

<pallas_src>
import functools
import math

import numpy as np
import jax
import jax.numpy as jnp
from jax.experimental import pallas as pl
from jax.experimental.pallas import tpu as pltpu


# ------------------- projection matmul (+ fused per-tile min/max) -------------------

def _project_kernel(a_ref, p_ref, o_ref, mn_ref, mx_ref, *, nrows, tm):
    i = pl.program_id(0)
    y = jnp.dot(a_ref[...], p_ref[...], preferred_element_type=jnp.float32)
    o_ref[...] = y.astype(o_ref.dtype)

    # Mask rows of a (possibly partial) last tile so edge-padding garbage
    # cannot pollute the min/max partials.
    rvalid = (jax.lax.broadcasted_iota(jnp.int32, (tm, 1), 0) + i * tm) < nrows
    pmin = jnp.min(jnp.where(rvalid, y, jnp.inf), axis=0, keepdims=True)    # (1, F)
    pmax = jnp.max(jnp.where(rvalid, y, -jnp.inf), axis=0, keepdims=True)   # (1, F)

    # Per-tile partials (no running accumulator) -> grid axis stays "parallel"
    # so both v7x TensorCores can stream this HBM-bound pass.
    mn_ref[...] = jnp.broadcast_to(pmin[None], mn_ref.shape)                # (1, 8, F)
    mx_ref[...] = jnp.broadcast_to(pmax[None], mx_ref.shape)


def project_minmax(matrix4, params, out_dtype=jnp.float32, target_block_bytes=2 << 20):
    """matrix4: (E, L, M, F), params: (F, F) ->
       projected (E*L*M, F), global min, global max (single HBM pass)."""
    E, L, M, F = matrix4.shape
    nrows = E * L * M
    a = matrix4.reshape(nrows, F)

    # ~2 MiB row blocks: this pass is HBM-bound, small blocks leave bandwidth
    # on the table (per-step overhead + short DMAs).
    tm_cap = max(8, ((target_block_bytes // (4 * F)) // 8) * 8)
    tm = nrows if nrows <= tm_cap else tm_cap
    nt = pl.cdiv(nrows, tm)

    proj, mn, mx = pl.pallas_call(
        functools.partial(_project_kernel, nrows=nrows, tm=tm),
        out_shape=(jax.ShapeDtypeStruct((nrows, F), out_dtype),
                   jax.ShapeDtypeStruct((nt, 8, F), jnp.float32),
                   jax.ShapeDtypeStruct((nt, 8, F), jnp.float32)),
        grid=(nt,),
        in_specs=[pl.BlockSpec((tm, F), lambda i: (i, 0)),
                  pl.BlockSpec((F, F), lambda i: (0, 0))],
        out_specs=(pl.BlockSpec((tm, F), lambda i: (i, 0)),
                   pl.BlockSpec((1, 8, F), lambda i: (i, 0, 0)),
                   pl.BlockSpec((1, 8, F), lambda i: (i, 0, 0))),
        compiler_params=pltpu.CompilerParams(
            dimension_semantics=("parallel",)),
    )(a, params)
    return proj, jnp.min(mn), jnp.max(mx)


# ------------------------------- KDE pairwise distance -------------------------------

def _kde_dis_kernel(scal_ref, aux_ref, proj_ref, dis_ref, s_acc,
                    *, E, F, M, tm, pb, pairs, sample_size, ragged, exp_dtype):
    l = pl.program_id(0)              # label (parallel)
    b = pl.program_id(1)              # grid-point batch (reduction)
    mt = pl.program_id(2)             # sample(M)-tile (reduction)
    n_mt = pl.num_programs(2)

    @pl.when((b == 0) & (mt == 0))
    def _init_out():
        dis_ref[...] = jnp.zeros_like(dis_ref)

    @pl.when(mt == 0)
    def _init_acc():
        s_acc[...] = jnp.zeros_like(s_acc)

    left = scal_ref[0]
    step = scal_ref[1]                # linspace spacing: (right - left) / (P - 1)
    log_offset = scal_ref[2]          # -0.5 / bandwidth**2

    # Grid points of this batch on the lane dim.
    idx = jax.lax.broadcasted_iota(jnp.int32, (1, pb), 1) + b * pb       # (1, pb)
    pts = left + idx.astype(jnp.float32) * step                          # (1, pb) f32

    cdt = exp_dtype                   # compute dtype of the elementwise chain
    pts_c = pts.astype(cdt)
    lo_c = log_offset.astype(cdt)
    if ragged:                        # only emitted when tm does not divide M
        row_valid = (jax.lax.broadcasted_iota(jnp.int32, (tm, 1, 1), 0) + mt * tm) < M

    # Accumulate sum_m exp(log_offset*(proj - x)^2) one env at a time; pl.loop
    # bounds the live range of the (tm, F, pb) temporaries to a single env.
    @pl.loop(0, E)
    def _env(e):
        pe = proj_ref[e][0].astype(cdt)                                  # (tm, F)
        d = (jax.lax.broadcast_in_dim(pe, (tm, F, pb), (0, 1))
             - jax.lax.broadcast_in_dim(pts_c, (tm, F, pb), (0, 2)))
        w = jnp.exp(lo_c * jnp.square(d))                                # bf16 on v6e/v7x
        if ragged:
            w = jnp.where(row_valid, w, 0.0)
        s_acc[e] = s_acc[e] + jnp.sum(w, axis=0, dtype=jnp.float32)      # (F, pb) f32

    # On the last M-tile: zero-row correction, per-env scaling, and the i<j
    # pairwise |reducer_i - reducer_j| reduction over grid points.
    @pl.when(mt == n_mt - 1)
    def _finish_batch():
        zero_w = jnp.exp(log_offset * pts * pts)                         # (1, pb) f32
        reducers = []
        for e in range(E):            # small static loop; only (F, pb) temps
            zc = aux_ref[(l * E + e) * 2 + 0]   # M - data_len[e, l]
            il = aux_ref[(l * E + e) * 2 + 1]   # inv_divisor / data_len[e, l]
            reducers.append((s_acc[e] - zc * zero_w) * il)               # (F, pb)
        if sample_size % pb != 0:     # mask only emitted when the tail is ragged
            valid = (idx < sample_size).astype(jnp.float32)
            reducers = [r * valid for r in reducers]
        diffs = jnp.stack([jnp.abs(reducers[i] - reducers[j])
                           for (i, j) in pairs], axis=0)                 # (P, F, pb)
        dis_ref[...] += jnp.sum(diffs, axis=-1)[None, :, :]              # (1, P, F)


def _pick_sample_tile(M, budget):
    """Largest sample-tile that needs no padding: M itself if it fits, else the
    largest multiple-of-8 divisor of M <= budget, else a ragged multiple of 8."""
    if M <= budget:
        return M
    cap = max(8, (budget // 8) * 8)
    best = 0
    t = 8
    while t <= cap:
        if M % t == 0:
            best = t
        t += 8
    return best if best else cap      # ragged fallback (in-kernel row mask)


def kde_pairwise_dis(proj4, lens, left, step, log_offset, inv_divisor,
                     sample_size, pairs, pb=128, tm_samples=256,
                     exp_dtype=jnp.float32):
    """proj4: (E, L, M, F).  Returns (L, n_pairs, F) accumulated distances for
    the i<j env pairs (with 1/divisor already folded in)."""
    E, L, M, F = proj4.shape
    n_pairs = len(pairs)

    tm = _pick_sample_tile(M, tm_samples)
    n_mt = pl.cdiv(M, tm)
    ragged = (M % tm) != 0            # no jnp.pad copy of proj in any case

    nb = pl.cdiv(sample_size, pb)

    scal = jnp.stack([jnp.asarray(left, jnp.float32),
                      jnp.asarray(step, jnp.float32),
                      jnp.asarray(log_offset, jnp.float32)])              # SMEM
    zero_coeff = jnp.float32(M) - lens                                    # (E, L)
    inv_lens = inv_divisor / lens                                         # (E, L)
    aux = jnp.stack([zero_coeff.T, inv_lens.T], axis=-1).reshape(-1).astype(jnp.float32)

    # Explicit scoped-VMEM budget with headroom (tight on v7x 64 MiB / v5e 16 MiB).
    itemsize = jnp.dtype(proj4.dtype).itemsize
    need = (2 * E * tm * F * itemsize          # double-buffered proj blocks
            + E * F * pb * 4                   # s_acc scratch
            + 4 * tm * F * pb * 4              # bounded per-env temporaries
            + 2 * n_pairs * F * 4 + (2 << 20))
    vmem_limit = int(min(max(2 * need, 32 << 20), 64 << 20))

    cost = pl.CostEstimate(
        flops=int(5 * E * L * M * F * sample_size
                  + 3 * n_pairs * L * F * sample_size),
        transcendentals=int(E * L * M * F * sample_size),
        bytes_accessed=int(itemsize * E * L * M * F * nb
                           + 4 * (L * n_pairs * F + scal.size + aux.size)),
    )

    dis = pl.pallas_call(
        functools.partial(_kde_dis_kernel, E=E, F=F, M=M, tm=tm, pb=pb,
                          pairs=tuple(pairs), sample_size=sample_size,
                          ragged=ragged, exp_dtype=exp_dtype),
        out_shape=jax.ShapeDtypeStruct((L, n_pairs, F), jnp.float32),
        grid=(L, nb, n_mt),
        in_specs=[
            pl.BlockSpec(memory_space=pltpu.MemorySpace.SMEM),            # scalars
            pl.BlockSpec(memory_space=pltpu.MemorySpace.SMEM),            # per-(e,l) coeffs
            pl.BlockSpec((E, 1, tm, F), lambda l, b, mt: (0, l, mt, 0)),  # proj tile
        ],
        out_specs=pl.BlockSpec((1, n_pairs, F), lambda l, b, mt: (l, 0, 0)),
        scratch_shapes=[pltpu.VMEM((E, F, pb), jnp.float32)],             # sum-over-M acc
        compiler_params=pltpu.CompilerParams(
            dimension_semantics=("parallel", "arbitrary", "arbitrary"),
            vmem_limit_bytes=vmem_limit),
        cost_estimate=cost,
    )(scal, aux, proj4)
    return dis


# ----------------------------------- forward wrapper -----------------------------------

def opt_kde_forward(matrix, params, data_len, sample_size, envs, train_env,
                    pb=128, tm_samples=256, exp_dtype=jnp.float32,
                    proj_dtype=jnp.float32):
    """matrix: zero-padded (E, L, M, F); params: (F, F); data_len: (E, L).
    exp_dtype=jnp.bfloat16 / proj_dtype=jnp.bfloat16 are v6e/v7x throughput
    knobs (validate accuracy per-dataset); keep float32 on v5e."""
    E, L, M, F = matrix.shape

    # --- setup statistics (mirrors opt_kde.__init__) ---
    # std over the zero-padded rows matches the torch reference convention.
    std0 = jnp.mean(jnp.std(matrix, axis=2, ddof=1))
    # mean(std(matrix/std0, axis=2)) == 1 by construction -> no second std pass.
    bandwidth = 1.06 * (float(M) ** (-1.0 / 5.0))
    log_offset = -0.5 / bandwidth ** 2                         # ln(offset), no exp/log trip
    inv_divisor = 1.0 / (math.sqrt(2.0 * math.pi) * bandwidth)
    lens = data_len.astype(jnp.float32)   # TODO(synk): data_len == 0 yields inf (as in torch)

    # --- forward ---
    # Fold 1/std0 into the weights: (matrix/std0) @ params == matrix @ (params/std0),
    # saving a full elementwise HBM pass over the (E,L,M,F) array.
    proj, left, right = project_minmax(matrix, params / std0, out_dtype=proj_dtype)
    delta = (right - left) / sample_size
    step = (right - left) / max(sample_size - 1, 1)            # torch.linspace spacing

    pairs = [(i, j) for i in range(E) for j in range(E) if i < j]
    train_sel = [k for k, (i, j) in enumerate(pairs)
                 if envs[i] in train_env and envs[j] in train_env]

    dis = kde_pairwise_dis(proj.reshape(E, L, M, F), lens, left, step,
                           log_offset, inv_divisor, sample_size, pairs,
                           pb=pb, tm_samples=tm_samples, exp_dtype=exp_dtype)
    dis = jnp.transpose(dis, (1, 0, 2))                        # (n_pairs, L, F)
    scaled = dis * (delta * 0.5)

    test_results = jnp.max(scaled, axis=0)                     # all i<j pairs
    train_results = jnp.max(scaled[jnp.array(train_sel)], axis=0)
    return {
        "train_results": train_results,
        "test_results": test_results,
        "train_info": None,
        "train_dis": jnp.mean(jnp.max(train_results, axis=0)),
        "test_dis": jnp.mean(jnp.max(test_results, axis=0)),
        "info_mean": None,
    }


# ----------------------------------- pure-JAX reference -----------------------------------

def reference_forward(matrix, params, data_len, sample_size, envs, train_env):
    E, L, M, F = matrix.shape
    std0 = jnp.mean(jnp.std(matrix, axis=2, ddof=1))
    matrix_n = matrix / std0
    bandwidth = (1.06 * (float(M) ** (-1.0 / 5.0))
                 * jnp.mean(jnp.std(matrix_n, axis=2, ddof=1)))
    offset = jnp.exp(-0.5 / bandwidth ** 2)
    divisor = jnp.sqrt(2.0 * jnp.pi) * bandwidth
    lens = data_len.astype(jnp.float32)

    proj = jnp.einsum("elmf,fg->elmg", matrix_n, params)
    left, right = jnp.min(proj), jnp.max(proj)
    delta = (right - left) / sample_size
    x = jnp.linspace(left, right, sample_size)

    pw = offset ** ((proj[..., None] - x.reshape(1, 1, 1, 1, -1)) ** 2)
    s = jnp.sum(pw, axis=2)                                         # (E,L,F,P)
    zt = (M - lens)[:, :, None, None] * (offset ** (x ** 2)).reshape(1, 1, 1, -1)
    reducer = (s - zt) / lens[:, :, None, None]
    dis = jnp.sum(jnp.abs(reducer[:, None] - reducer[None, :]), axis=-1) / divisor
    store_dis = dis.reshape(E * E, L, F)

    train_index, test_index = [], []
    idx = 0
    for i in range(E):
        for j in range(E):
            if envs[i] in train_env and envs[j] in train_env and i < j:
                train_index.append(idx)
            if i < j:
                test_index.append(idx)
            idx += 1

    test_results = jnp.max(store_dis[jnp.array(test_index)] * delta / 2.0, axis=0)
    train_results = jnp.max(store_dis[jnp.array(train_index)] * delta / 2.0, axis=0)
    return {
        "train_results": train_results,
        "test_results": test_results,
        "train_dis": jnp.mean(jnp.max(train_results, axis=0)),
        "test_dis": jnp.mean(jnp.max(test_results, axis=0)),
    }


# ----------------------------------- demo -----------------------------------

if __name__ == "__main__":
    E, L, M, F = 3, 2, 16, 8          # envs, classes, max samples, features
    sample_size = 256
    envs = [0, 1, 2]
    train_env = [0, 1]

    # deterministic per-(env, label) sample counts
    data_len = np.array([[16, 12], [14, 16], [10, 13]], dtype=np.int32)

    key = jax.random.PRNGKey(0)
    raw = jax.random.normal(key, (E, L, M, F), dtype=jnp.float32)
    pad_mask = (np.arange(M)[None, None, :] < data_len[:, :, None]).astype(np.float32)
    matrix = raw * jnp.asarray(pad_mask)[..., None]   # zero-padded like shape_to_matrix

    params = jnp.eye(F, dtype=jnp.float32)            # torch.eye(feature_num)
    data_len_j = jnp.asarray(data_len)

    out = opt_kde_forward(matrix, params, data_len_j, sample_size, envs, train_env)
    jax.block_until_ready(out["train_results"])
    jax.block_until_ready(out["test_results"])

    ref = reference_forward(matrix, params, data_len_j, sample_size, envs, train_env)
    np.testing.assert_allclose(np.asarray(out["train_results"]),
                               np.asarray(ref["train_results"]), rtol=5e-3, atol=1e-4)
    np.testing.assert_allclose(np.asarray(out["test_results"]),
                               np.asarray(ref["test_results"]), rtol=5e-3, atol=1e-4)
    np.testing.assert_allclose(float(out["train_dis"]), float(ref["train_dis"]), rtol=5e-3)
    np.testing.assert_allclose(float(out["test_dis"]), float(ref["test_dis"]), rtol=5e-3)

    print("KERNEL_OK")
</pallas_src>

<mosaic_0001>
module attributes {stable_mosaic.version = 11 : i64} {
  func.func @_project_kernel(%arg0: i32, %arg1: memref<96x8xf32, #tpu.memory_space<vmem>>, %arg2: memref<8x8xf32, #tpu.memory_space<vmem>>, %arg3: memref<96x8xf32, #tpu.memory_space<vmem>>, %arg4: memref<1x8x8xf32, #tpu.memory_space<vmem>>, %arg5: memref<1x8x8xf32, #tpu.memory_space<vmem>>) attributes {dimension_semantics = [#tpu.dimension_semantics<parallel>], iteration_bounds = array<i64: 1>, scalar_prefetch = 0 : i64, scratch_operands = 0 : i64, tpu.core_type = #tpu.core_type<tc>, window_params = [{transform_indices = @transform_0, window_bounds = array<i64: 96, 8>}, {pipeline_mode = #tpu.pipeline_mode<synchronous>, transform_indices = @transform_1, window_bounds = array<i64: 8, 8>}, {transform_indices = @transform_2, window_bounds = array<i64: 96, 8>}, {transform_indices = @transform_3, window_bounds = array<i64: 1, 8, 8>}, {transform_indices = @transform_4, window_bounds = array<i64: 1, 8, 8>}]} {
    %c0 = arith.constant 0 : index
    %c0_0 = arith.constant 0 : index
    %0 = vector.load %arg1[%c0, %c0_0] : memref<96x8xf32, #tpu.memory_space<vmem>>, vector<96x8xf32>
    %c0_1 = arith.constant 0 : index
    %c0_2 = arith.constant 0 : index
    %1 = vector.load %arg2[%c0_1, %c0_2] : memref<8x8xf32, #tpu.memory_space<vmem>>, vector<8x8xf32>
    %cst = arith.constant dense<0.000000e+00> : vector<96x8xf32>
    %2 = tpu.matmul %0, %1, %cst {dimension_numbers = #tpu.dot_dimension_numbers<[1], [0], [0], [1], [0, 0, 1, 1], [], []>} : vector<96x8xf32>, vector<8x8xf32>, vector<96x8xf32> -> vector<96x8xf32>
    %c0_3 = arith.constant 0 : index
    %c0_4 = arith.constant 0 : index
    %3 = vector.load %arg3[%c0_3, %c0_4] : memref<96x8xf32, #tpu.memory_space<vmem>>, vector<96x8xf32>
    tpu.vector_store %arg3[%c0_3, %c0_4], %2 {strides = array<i32>} : memref<96x8xf32, #tpu.memory_space<vmem>>, vector<96x8xf32>,
    %4 = tpu.iota {dimensions = array<i32: 0>} : vector<96x1xi32>
    %c96_i32 = arith.constant 96 : i32
    %5 = arith.muli %arg0, %c96_i32 : i32
    %6 = vector.broadcast %5 : i32 to vector<96x1xi32>
    %7 = arith.addi %4, %6 : vector<96x1xi32>
    %c96_i32_5 = arith.constant 96 : i32
    %8 = vector.broadcast %c96_i32_5 : i32 to vector<96x1xi32>
    %9 = arith.cmpi slt, %7, %8 : vector<96x1xi32>
    %cst_6 = arith.constant 0x7F800000 : f32
    %10 = vector.shape_cast %9 : vector<96x1xi1> to vector<96x1xi1>
    %11 = vector.broadcast %10 : vector<96x1xi1> to vector<96x8xi1>
    %12 = vector.broadcast %cst_6 : f32 to vector<96x8xf32>
    %13 = arith.select %11, %2, %12 : vector<96x8xi1>, vector<96x8xf32>
    %cst_7 = arith.constant dense<0x7F800000> : vector<8xf32>
    %14 = vector.multi_reduction <minimumf>, %13, %cst_7 [0] : vector<96x8xf32> to vector<8xf32>
    %15 = vector.shape_cast %14 : vector<8xf32> to vector<1x8xf32>
    %cst_8 = arith.constant 0xFF800000 : f32
    %16 = vector.shape_cast %9 : vector<96x1xi1> to vector<96x1xi1>
    %17 = vector.broadcast %16 : vector<96x1xi1> to vector<96x8xi1>
    %18 = vector.broadcast %cst_8 : f32 to vector<96x8xf32>
    %19 = arith.select %17, %2, %18 : vector<96x8xi1>, vector<96x8xf32>
    %cst_9 = arith.constant dense<0xFF800000> : vector<8xf32>
    %20 = vector.multi_reduction <maximumf>, %19, %cst_9 [0] : vector<96x8xf32> to vector<8xf32>
    %21 = vector.shape_cast %20 : vector<8xf32> to vector<1x8xf32>
    %22 = vector.shape_cast %15 : vector<1x8xf32> to vector<1x1x8xf32>
    %23 = vector.shape_cast %22 : vector<1x1x8xf32> to vector<1x1x8xf32>
    %24 = vector.broadcast %23 : vector<1x1x8xf32> to vector<1x8x8xf32>
    %c0_10 = arith.constant 0 : index
    %c0_11 = arith.constant 0 : index
    %c0_12 = arith.constant 0 : index
    %25 = vector.load %arg4[%c0_10, %c0_11, %c0_12] : memref<1x8x8xf32, #tpu.memory_space<vmem>>, vector<1x8x8xf32>
    tpu.vector_store %arg4[%c0_10, %c0_11, %c0_12], %24 {strides = array<i32>} : memref<1x8x8xf32, #tpu.memory_space<vmem>>, vector<1x8x8xf32>,
    %26 = vector.shape_cast %21 : vector<1x8xf32> to vector<1x1x8xf32>
    %27 = vector.shape_cast %26 : vector<1x1x8xf32> to vector<1x1x8xf32>
    %28 = vector.broadcast %27 : vector<1x1x8xf32> to vector<1x8x8xf32>
    %c0_13 = arith.constant 0 : index
    %c0_14 = arith.constant 0 : index
    %c0_15 = arith.constant 0 : index
    %29 = vector.load %arg5[%c0_13, %c0_14, %c0_15] : memref<1x8x8xf32, #tpu.memory_space<vmem>>, vector<1x8x8xf32>
    tpu.vector_store %arg5[%c0_13, %c0_14, %c0_15], %28 {strides = array<i32>} : memref<1x8x8xf32, #tpu.memory_space<vmem>>, vector<1x8x8xf32>,
    return
  }
  func.func @transform_0(%arg0: i32) -> (i32, i32) {
    %c0_i32 = arith.constant 0 : i32
    %c0_i32_0 = arith.constant 0 : i32
    return %arg0, %c0_i32 : i32, i32
  }
  func.func @transform_1(%arg0: i32) -> (i32, i32) {
    %c0_i32 = arith.constant 0 : i32
    %c0_i32_0 = arith.constant 0 : i32
    %c0_i32_1 = arith.constant 0 : i32
    return %c0_i32, %c0_i32_0 : i32, i32
  }
  func.func @transform_2(%arg0: i32) -> (i32, i32) {
    %c0_i32 = arith.constant 0 : i32
    %c0_i32_0 = arith.constant 0 : i32
    return %arg0, %c0_i32 : i32, i32
  }
  func.func @transform_3(%arg0: i32) -> (i32, i32, i32) {
    %c0_i32 = arith.constant 0 : i32
    %c0_i32_0 = arith.constant 0 : i32
    %c0_i32_1 = arith.constant 0 : i32
    return %arg0, %c0_i32, %c0_i32_0 : i32, i32, i32
  }
  func.func @transform_4(%arg0: i32) -> (i32, i32, i32) {
    %c0_i32 = arith.constant 0 : i32
    %c0_i32_0 = arith.constant 0 : i32
    %c0_i32_1 = arith.constant 0 : i32
    return %arg0, %c0_i32, %c0_i32_0 : i32, i32, i32
  }
}

</mosaic_0001>

<bundles_post_ra>
// kernel: tpu_custom_call.1
= control target key start
LH: loop header
LB: loop body
LE: loop exit
PB: predicated region body
PF: predicated region fallthrough
CT: control target
= control target key end

     0   :  { %10 = vsyncpa [#allocation3], 0  ;;  %vm29_vm0 = vcmask 64512   ;;  %s633_s0 = inlined_call_operand.vmem [shape: f32[96,8], index: 0, kind: input, shape index: {}]   ;;  %s634_s1 = inlined_call_operand.vmem [shape: f32[8,8], index: 1, kind: input, shape index: {}]   ;;  %s635_s2 = inlined_call_operand.vmem [shape: f32[96,8], index: 2, kind: output, shape index: {0}]   ;;  %s636_s3 = inlined_call_operand.hbm [shape: f32[1,8,8], index: 3, kind: output, shape index: {1}]   ;;  %s637_s4 = inlined_call_operand.hbm [shape: f32[1,8,8], index: 4, kind: output, shape index: {2}]  }
   0x1   :  { %v28_v0 = vld [vmem:[%s634_s1] sm:$0xff]  ;;  %v22_v2 = vld [vmem:[%s633_s0 + $0x30] sm:$0xff]  ;;  %v17_v3 = vld [vmem:[%s633_s0 + $0x8] sm:$0xff] }
   0x2   :  { %v16_v1 = vld [vmem:[%s633_s0] sm:$0xff]  ;;  %407 = vmatprep.subr.mxu0 %v28_v0  ;;  %427 = vmatprep.subr.mxu1 %v28_v0  ;;  %v23_v4 = vld [vmem:[%s633_s0 + $0x38] sm:$0xff]  ;;  %v18_v5 = vld [vmem:[%s633_s0 + $0x10] sm:$0xff] }
   0x3   :  { %408 = vmatpush3.msra.mxu0 %v28_v0  ;;  %428 = vmatpush3.msra.mxu1 %v28_v0  ;;  %v24_v6 = vld [vmem:[%s633_s0 + $0x40] sm:$0xff] }
   0x4   :  { %409 = vmatprep.mubr.msk.f32.mxu0 %vm29_vm0, %v16_v1  ;;  %418 = vmatprep.mubr.msk.f32.mxu1 %vm29_vm0, %v22_v2 }
   0x5   :  { %410 = vmatmul.mubr.msk.f32.vlgmr.msra.gmra.mxu0 %vm29_vm0, %v17_v3  ;;  %419 = vmatmul.mubr.msk.f32.vlgmr.msra.gmra.mxu1 %vm29_vm0, %v23_v4 }
   0x6   :  { %11 = vsyncpa [#allocation5], 0  ;;  %412 = vmatprep.mubr.msk.f32.mxu0 %vm29_vm0, %v18_v5  ;;  %421 = vmatprep.mubr.msk.f32.mxu1 %vm29_vm0, %v24_v6  ;;  %v19_v7 = vld [vmem:[%s633_s0 + $0x18] sm:$0xff]  ;;  %v25_v8 = vld [vmem:[%s633_s0 + $0x48] sm:$0xff]  ;;  %s476_s11 = smov [#allocation4]  }
   0x7   :  { %v20_v9 = vld [vmem:[%s633_s0 + $0x20] sm:$0xff]  ;;  %v26_v10 = vld [vmem:[%s633_s0 + $0x50] sm:$0xff]  ;;  %v21_v11 = vld [vmem:[%s633_s0 + $0x28] sm:$0xff]  ;;  %s368_s12 = sshll.u32 %s476_s11, 4  ;;  %s369_s12 = int_to_ptr.vmem [resolvable:$true] %s368_s12 }
   0x8   :  { %v27_v12 = vld [vmem:[%s633_s0 + $0x58] sm:$0xff] }
   0x9   :  { %413 = vmatmul.mubr.msk.f32.gmra.mxu0 %vm29_vm0, %v19_v7  ;;  %422 = vmatmul.mubr.msk.f32.gmra.mxu1 %vm29_vm0, %v25_v8 }
   0xa   :  { %415 = vmatprep.mubr.msk.f32.mxu0 %vm29_vm0, %v20_v9  ;;  %424 = vmatprep.mubr.msk.f32.mxu1 %vm29_vm0, %v26_v10 }
   0xd   :  { %416 = vmatmul.mubr.msk.f32.gmra.mxu0 %vm29_vm0, %v21_v11  ;;  %425 = vmatmul.mubr.msk.f32.gmra.mxu1 %vm29_vm0, %v27_v12 }
  0xc5   :  { %v411_v13 = vpop.f32.mrf.mxu0  ;;  %v420_v14 = vpop.f32.mrf.mxu1 }
  0xc6   :  { %192 = vst.msk [vmem:[%s635_s2 + $0x8] sm:$0xff] %vm29_vm0, %v411_v13  ;;  %198 = vst.msk [vmem:[%s635_s2 + $0x38] sm:$0xff] %vm29_vm0, %v420_v14  ;;  %v279_v19 = vsel %vm29_vm0, %v411_v13, inf  ;;  %v320_v20 = vsel %vm29_vm0, %v411_v13, -inf  ;;  %v288_v23 = vsel %vm29_vm0, %v420_v14, inf  ;;  %v329_v24 = vsel %vm29_vm0, %v420_v14, -inf }
  0xc7   :  { %v132_v15 = vpop.f32.mrf.mxu0  ;;  %v162_v16 = vpop.f32.mrf.mxu1 }
  0xc8   :  { %191 = vst.msk [vmem:[%s635_s2] sm:$0xff] %vm29_vm0, %v132_v15  ;;  %197 = vst.msk [vmem:[%s635_s2 + $0x30] sm:$0xff] %vm29_vm0, %v162_v16  ;;  %v278_v25 = vsel %vm29_vm0, %v132_v15, inf  ;;  %v319_v26 = vsel %vm29_vm0, %v132_v15, -inf  ;;  %v286_v29 = vsel %vm29_vm0, %v162_v16, inf  ;;  %v327_v30 = vsel %vm29_vm0, %v162_v16, -inf }
  0xc9   :  { %v414_v17 = vpop.f32.mrf.mxu0  ;;  %v423_v18 = vpop.f32.mrf.mxu1 }
  0xca   :  { %194 = vst.msk [vmem:[%s635_s2 + $0x18] sm:$0xff] %vm29_vm0, %v414_v17  ;;  %v281_v21 = vsel %vm29_vm0, %v414_v17, inf  ;;  %v322_v22 = vsel %vm29_vm0, %v414_v17, -inf  ;;  %200 = vst.msk [vmem:[%s635_s2 + $0x48] sm:$0xff] %vm29_vm0, %v423_v18  ;;  %v292_v35 = vsel %vm29_vm0, %v423_v18, inf  ;;  %v333_v36 = vsel %vm29_vm0, %v423_v18, -inf }
  0xcb   :  { %v142_v27 = vpop.f32.mrf.mxu0  ;;  %v172_v28 = vpop.f32.mrf.mxu1  ;;  %v289_v33 = vmin.f32 %v281_v21, %v288_v23  ;;  %v330_v34 = vmax.f32 %v322_v22, %v329_v24 }
  0xcc   :  { %193 = vst.msk [vmem:[%s635_s2 + $0x10] sm:$0xff] %vm29_vm0, %v142_v27  ;;  %v280_v31 = vsel %vm29_vm0, %v142_v27, inf  ;;  %v321_v32 = vsel %vm29_vm0, %v142_v27, -inf  ;;  %199 = vst.msk [vmem:[%s635_s2 + $0x40] sm:$0xff] %vm29_vm0, %v172_v28  ;;  %v290_v53 = vsel %vm29_vm0, %v172_v28, inf  ;;  %v331_v54 = vsel %vm29_vm0, %v172_v28, -inf }
  0xcd   :  { %v417_v37 = vpop.f32.mrf.mxu0  ;;  %v426_v38 = vpop.f32.mrf.mxu1  ;;  %v287_v39 = vmin.f32 %v280_v31, %v286_v29  ;;  %v328_v40 = vmax.f32 %v321_v32, %v327_v30 }
  0xce   :  { %196 = vst.msk [vmem:[%s635_s2 + $0x28] sm:$0xff] %vm29_vm0, %v417_v37  ;;  %v284_v41 = vsel %vm29_vm0, %v417_v37, inf  ;;  %v325_v42 = vsel %vm29_vm0, %v417_v37, -inf  ;;  %202 = vst.msk [vmem:[%s635_s2 + $0x58] sm:$0xff] %vm29_vm0, %v426_v38  ;;  %v296_v45 = vsel %vm29_vm0, %v426_v38, inf  ;;  %v337_v46 = vsel %vm29_vm0, %v426_v38, -inf }
  0xcf   :  { %v285_v43 = vmin.f32 %v279_v19, %v284_v41  ;;  %v326_v44 = vmax.f32 %v320_v20, %v325_v42  ;;  %v152_v47 = vpop.f32.mrf.mxu0  ;;  %v182_v48 = vpop.f32.mrf.mxu1  ;;  %v297_v57 = vmin.f32 %v289_v33, %v296_v45  ;;  %v338_v58 = vmax.f32 %v330_v34, %v337_v46 }
  0xd0   :  { %195 = vst.msk [vmem:[%s635_s2 + $0x20] sm:$0xff] %vm29_vm0, %v152_v47  ;;  %v282_v49 = vsel %vm29_vm0, %v152_v47, inf  ;;  %v323_v50 = vsel %vm29_vm0, %v152_v47, -inf  ;;  %201 = vst.msk [vmem:[%s635_s2 + $0x50] sm:$0xff] %vm29_vm0, %v182_v48  ;;  %v294_v51 = vsel %vm29_vm0, %v182_v48, inf  ;;  %v335_v52 = vsel %vm29_vm0, %v182_v48, -inf }
  0xd1   :  { %v283_v55 = vmin.f32 %v278_v25, %v282_v49  ;;  %v324_v56 = vmax.f32 %v319_v26, %v323_v50  ;;  %v295_v59 = vmin.f32 %v287_v39, %v294_v51  ;;  %v336_v60 = vmax.f32 %v328_v40, %v335_v52  ;;  %s475_s2 = smov [#allocation2]  }
  0xd2   :  { %v293_v61 = vmin.f32 %v285_v43, %v292_v35  ;;  %v334_v62 = vmax.f32 %v326_v44, %v333_v36  ;;  %s358_s10 = sshll.u32 %s475_s2, 4  ;;  %s359_s10 = int_to_ptr.vmem [resolvable:$true] %s358_s10 }
  0xd3   :  { %v291_v63 = vmin.f32 %v283_v55, %v290_v53  ;;  %v332_v0 = vmax.f32 %v324_v56, %v331_v54  ;;  %v299_v3 = vmin.f32 %v295_v59, %v297_v57  ;;  %v340_v4 = vmax.f32 %v336_v60, %v338_v58  ;;  %s431_s13 = scalar_lea.vmem %s359_s10, 128  ;;  %p436_p1 = scmp.lt.s32.totalorder %s359_s10, %s359_s10 }
  0xd4   :  { %p432_p0 = scmp.ne.s32.totalorder %s359_s10, %s431_s13  ;;  %p437_p2 = scmp.lt.s32.totalorder %s431_s13, %s431_s13 }
  0xd5   :  { %v298_v1 = vmin.f32 %v291_v63, %v293_v61  ;;  %v339_v2 = vmax.f32 %v332_v0, %v334_v62 }
  0xd6   :  { %p438_p3 = por %p437_p2, %p436_p1 }
  0xd7   :  { %v300_v5 = vmin.f32 %v298_v1, %v299_v3  ;;  %v341_v6 = vmax.f32 %v339_v2, %v340_v4 }
  0xd8   :  { %p439_p4 = pnand %p438_p3, %p432_p0 }
  0xd9   :  { %v342_v7 = vrot.slane %v341_v6, 4  ;;  %v301_v8 = vrot.slane %v300_v5, 4 }
  0xdb   :  { %v302_v9 = vmin.f32 %v300_v5, %v301_v8  ;;  %v343_v10 = vmax.f32 %v341_v6, %v342_v7 }
  0xdd   :  { %v303_v11 = vrot.slane %v302_v9, 2  ;;  %v344_v12 = vrot.slane %v343_v10, 2 }
  0xdf   :  { %v304_v13 = vmin.f32 %v302_v9, %v303_v11  ;;  %v345_v14 = vmax.f32 %v343_v10, %v344_v12 }
  0xe1   :  { %v305_v15 = vrot.slane %v304_v13, 1  ;;  %v346_v16 = vrot.slane %v345_v14, 1 }
  0xe3   :  { %v306_v17 = vmin.f32 %v304_v13, %v305_v15  ;;  %v347_v18 = vmax.f32 %v345_v14, %v346_v16 }
  0xe5   :  { %348 = vst.msk [vmem:[#allocation2] sm:$0xff] %vm29_vm0, %v306_v17  ;;  %349 = vst.msk [vmem:[#allocation4] sm:$0xff] %vm29_vm0, %v347_v18 }
  0xe6   :  { %442 = shalt.err (!%p439_p4)
}
  0xe7   :  { %361 = dma.vmem_to_hbm [thread:$0]  %s359_s10, 128, %s636_s3, [#allocation3]  }
  0xe8   :  { %s451_s16 = scalar_lea.vmem %s369_s12, 128  ;;  %p456_p6 = scmp.lt.s32.totalorder %s369_s12, %s369_s12 }
  0xe9   :  { %p452_p5 = scmp.ne.s32.totalorder %s369_s12, %s451_s16  ;;  %p457_p7 = scmp.lt.s32.totalorder %s451_s16, %s451_s16 }
  0xeb   :  { %p458_p8 = por %p457_p7, %p456_p6 }
  0xed   :  { %p459_p9 = pnand %p458_p8, %p452_p5 }
  0xef   :  { %462 = shalt.err (!%p459_p9)
}
  0xf0   :  { %371 = dma.vmem_to_hbm [thread:$0]  %s369_s12, 128, %s637_s4, [#allocation5]  }
  0xf1   :  { %471 = dma.done.wait [#allocation3], 128  }
  0xf2   :  { %472 = vsyncadd [#allocation3], 4294967168 }
  0xf3   :  { %473 = dma.done.wait [#allocation5], 128  }
  0xf4   :  { %474 = vsyncadd [#allocation5], 4294967168 }
  0xf5   :  { %380 = vsyncpa [#allocation3], 1 }
  0xf6   :  { %381 = vsyncpa [#allocation5], 1 }

</bundles_post_ra>
